<compile_context>
chip_gen: v7x
topology: tpu7x:2x2x1
jax: 0.10.0
libtpu: 0.0.40
codegen_flags: <defaults>
</compile_context>

<pallas_src>
import numpy as np
import jax
import jax.numpy as jnp
from jax.experimental import pallas as pl
from jax.experimental.pallas import tpu as pltpu

_LANES = 128
_MAX_ROWS_PER_BLOCK = 1024   # 1 MiB f32 block: v5e-safe incl. arctan temporaries
_TARGET_GRID_STEPS = 4       # >=4 steps -> pipelining + dual-TC sharding on v7x

_INV_PI = float(1.0 / np.pi)
_HALF_PI = float(np.pi / 2.0)
_PI = float(np.pi)


def _atan_poly_coeffs(degree: int = 9):
    """Coefficients c[0..degree] (lowest first) of a polynomial in t = a**2
    approximating atan(a)/a on a in [0, 1]. Chebyshev-noded least-squares fit,
    max error ~1e-7 rad — far inside the 1e-5 phi tolerance."""
    n = 512
    k = np.arange(n) + 0.5
    t = 0.5 * (1.0 + np.cos(np.pi * k / n))         # Chebyshev nodes in (0, 1)
    a = np.sqrt(t)
    g = np.arctan(a) / a
    c = np.polynomial.polynomial.polyfit(t, g, degree)
    return tuple(float(np.float32(v)) for v in c)


_ATAN_C = _atan_poly_coeffs()


def _polar_kernel(xy_ref, out_ref):
    # xy_ref: (2, TH, 128) input-dtype tile (channel 0 = x, channel 1 = y).
    # out_ref: (2, TH, 128) f32 tile (channel 0 = rho, channel 1 = phi).
    x = xy_ref[0].astype(jnp.float32) - 0.5
    y = xy_ref[1].astype(jnp.float32) - 0.5
    out_ref[0] = jnp.sqrt(x * x + y * y)

    # atan2(y, x) / pi via octant reduction + odd minimax polynomial.
    ax = jnp.abs(x)
    ay = jnp.abs(y)
    mx = jnp.maximum(ax, ay)
    mn = jnp.minimum(ax, ay)
    a = mn / jnp.where(mx > 0.0, mx, jnp.float32(1.0))   # in [0, 1]; 0 when x=y=0
    t = a * a
    p = jnp.float32(_ATAN_C[-1])
    for c in _ATAN_C[-2::-1]:
        p = p * t + jnp.float32(c)
    r = a * p                                   # atan(a)
    r = jnp.where(ay > ax, _HALF_PI - r, r)     # undo min/max swap
    r = jnp.where(x < 0.0, _PI - r, r)          # left half-plane
    r = jnp.where(y < 0.0, -r, r)               # lower half-plane
    out_ref[1] = r * _INV_PI


def _pick_block_rows(rows: int, sublane: int) -> int:
    """Balanced, sublane-aligned block height targeting >= _TARGET_GRID_STEPS
    grid steps, capped so blocks stay small enough for every generation."""
    if rows <= sublane:
        return rows
    th = pl.cdiv(rows, _TARGET_GRID_STEPS)
    th = sublane * pl.cdiv(th, sublane)
    return min(th, _MAX_ROWS_PER_BLOCK, rows)


def _run_tiled(xy_lane: jax.Array, rows: int, sublane: int) -> jax.Array:
    """xy_lane: (R0 >= 2, rows, 128); rows 0/1 of axis 0 are the x/y planes.
    Returns (2, rows, 128) f32 with rho in channel 0 and phi in channel 1."""
    th = _pick_block_rows(rows, sublane)
    n_blocks = pl.cdiv(rows, th)
    n_elems = rows * _LANES  # per-channel element count
    in_bytes = 2 * n_elems * jnp.dtype(xy_lane.dtype).itemsize
    cost = pl.CostEstimate(
        flops=45 * n_elems,            # subs, rho, octant glue, poly, selects
        transcendentals=4 * n_elems,   # sqrt + divide (w/ refinement)
        bytes_accessed=in_bytes + 8 * n_elems,
    )
    return pl.pallas_call(
        _polar_kernel,
        out_shape=jax.ShapeDtypeStruct((2, rows, _LANES), jnp.float32),
        grid=(n_blocks,),
        in_specs=[pl.BlockSpec((2, th, _LANES), lambda i: (0, i, 0))],
        out_specs=pl.BlockSpec((2, th, _LANES), lambda i: (0, i, 0)),
        compiler_params=pltpu.CompilerParams(
            dimension_semantics=("parallel",),
        ),
        cost_estimate=cost,
    )(xy_lane)


def polar_transform(grid: jax.Array) -> jax.Array:
    """grid: (B, C, H, W) float, C >= 2. Returns (1, 2, H, W) float32."""
    assert grid.ndim == 4 and grid.shape[1] >= 2
    B, C, H, W = grid.shape
    n = H * W

    if grid.dtype not in (jnp.float32, jnp.bfloat16, jnp.float16):
        # Fallback for exotic dtypes: cast only the two consumed planes (still
        # avoids the whole-(B,C,H,W) convert).
        grid = grid[:1, :2].astype(jnp.float32)
        B, C = 1, 2

    sublane = 8 if grid.dtype == jnp.float32 else 16

    if n % _LANES == 0:
        # Fast path: pure row-major reshape (no HBM copy). Rows 0 and 1 of the
        # leading axis are exactly grid[0, 0] and grid[0, 1] flattened, so the
        # batch/channel slice is folded into the BlockSpec.
        rows = n // _LANES
        xy_lane = grid.reshape(B * C, rows, _LANES)
        out = _run_tiled(xy_lane, rows, sublane)
        return out.reshape(2, H, W)[None]

    # Ragged spatial size: extract the two planes, pad to a lane-dense multiple
    # of 128, drop the padding afterwards. Pad value 0.5 makes the discarded
    # tail compute rho=0, phi=0 (no NaN/inf even in debug runs).
    # TODO(synk): fold the tail into the kernel with a masked pltpu.store to
    # avoid the extra pad/slice HBM passes if ragged sizes become hot.
    pad = (-n) % _LANES
    xy = grid[0, 0:2].reshape(2, n)
    xy = jnp.pad(xy, ((0, 0), (0, pad)), constant_values=0.5)
    rows = (n + pad) // _LANES
    out = _run_tiled(xy.reshape(2, rows, _LANES), rows, sublane)
    out = out.reshape(2, n + pad)[:, :n]
    return out.reshape(2, H, W)[None]


if __name__ == "__main__":
    def _ref(g):
        g = np.asarray(g, dtype=np.float32) - 0.5
        x_np, y_np = g[0, 0], g[0, 1]
        rho = np.sqrt(x_np ** 2 + y_np ** 2)
        phi = np.arctan2(y_np, x_np) / np.pi
        return np.stack([rho, phi], 0)[None]

    k0, k1, k2 = jax.random.split(jax.random.PRNGKey(0), 3)

    # 1) Small shape from the module spec (single-block path).
    B, C, H, W = 2, 4, 16, 16
    g1 = jax.random.uniform(k0, (B, C, H, W), dtype=jnp.float32)
    r1 = jax.block_until_ready(polar_transform(g1))
    assert r1.shape == (1, 2, H, W), r1.shape
    np.testing.assert_allclose(np.asarray(r1), _ref(g1), rtol=1e-5, atol=1e-5)

    # 2) Larger plane: exercises the multi-block (pipelined / dual-TC) path
    #    with a partial trailing block.
    g2 = jax.random.uniform(k1, (1, 2, 160, 160), dtype=jnp.float32)
    r2 = jax.block_until_ready(polar_transform(g2))
    assert r2.shape == (1, 2, 160, 160), r2.shape
    np.testing.assert_allclose(np.asarray(r2), _ref(g2), rtol=1e-5, atol=1e-5)

    # 3) Ragged spatial size (H*W not a multiple of 128).
    g3 = jax.random.uniform(k2, (1, 3, 15, 15), dtype=jnp.float32)
    r3 = jax.block_until_ready(polar_transform(g3))
    assert r3.shape == (1, 2, 15, 15), r3.shape
    np.testing.assert_allclose(np.asarray(r3), _ref(g3), rtol=1e-5, atol=1e-5)

    print("KERNEL_OK")
</pallas_src>

<mosaic_0001>
module attributes {stable_mosaic.version = 11 : i64} {
  func.func @_polar_kernel(%arg0: i32, %arg1: memref<2x2x128xf32, #tpu.memory_space<vmem>>, %arg2: memref<2x2x128xf32, #tpu.memory_space<vmem>>) attributes {dimension_semantics = [#tpu.dimension_semantics<parallel>], iteration_bounds = array<i64: 1>, scalar_prefetch = 0 : i64, scratch_operands = 0 : i64, tpu.core_type = #tpu.core_type<tc>, window_params = [{transform_indices = @transform_0, window_bounds = array<i64: 2, 2, 128>}, {transform_indices = @transform_1, window_bounds = array<i64: 2, 2, 128>}]} {
    %c0 = arith.constant 0 : index
    %c0_0 = arith.constant 0 : index
    %c0_1 = arith.constant 0 : index
    %0 = vector.load %arg1[%c0, %c0_0, %c0_1] : memref<2x2x128xf32, #tpu.memory_space<vmem>>, vector<1x2x128xf32>
    %1 = vector.shape_cast %0 : vector<1x2x128xf32> to vector<2x128xf32>
    %cst = arith.constant 5.000000e-01 : f32
    %2 = vector.broadcast %cst : f32 to vector<2x128xf32>
    %3 = arith.subf %1, %2 : vector<2x128xf32>
    %c1 = arith.constant 1 : index
    %c0_2 = arith.constant 0 : index
    %c0_3 = arith.constant 0 : index
    %4 = vector.load %arg1[%c1, %c0_2, %c0_3] : memref<2x2x128xf32, #tpu.memory_space<vmem>>, vector<1x2x128xf32>
    %5 = vector.shape_cast %4 : vector<1x2x128xf32> to vector<2x128xf32>
    %cst_4 = arith.constant 5.000000e-01 : f32
    %6 = vector.broadcast %cst_4 : f32 to vector<2x128xf32>
    %7 = arith.subf %5, %6 : vector<2x128xf32>
    %8 = arith.mulf %3, %3 : vector<2x128xf32>
    %9 = arith.mulf %7, %7 : vector<2x128xf32>
    %10 = arith.addf %8, %9 : vector<2x128xf32>
    %11 = math.sqrt %10 : vector<2x128xf32>
    %c0_5 = arith.constant 0 : index
    %c0_6 = arith.constant 0 : index
    %c0_7 = arith.constant 0 : index
    %12 = vector.load %arg2[%c0_5, %c0_6, %c0_7] : memref<2x2x128xf32, #tpu.memory_space<vmem>>, vector<1x2x128xf32>
    %13 = vector.shape_cast %12 : vector<1x2x128xf32> to vector<2x128xf32>
    %14 = vector.shape_cast %11 : vector<2x128xf32> to vector<1x2x128xf32>
    tpu.vector_store %arg2[%c0_5, %c0_6, %c0_7], %14 {strides = array<i32>} : memref<2x2x128xf32, #tpu.memory_space<vmem>>, vector<1x2x128xf32>,
    %15 = math.absf %3 : vector<2x128xf32>
    %16 = math.absf %7 : vector<2x128xf32>
    %17 = arith.maximumf %15, %16 : vector<2x128xf32>
    %18 = arith.minimumf %15, %16 : vector<2x128xf32>
    %cst_8 = arith.constant 0.000000e+00 : f32
    %19 = vector.broadcast %cst_8 : f32 to vector<2x128xf32>
    %20 = arith.cmpf ogt, %17, %19 : vector<2x128xf32>
    %cst_9 = arith.constant 1.000000e+00 : f32
    %21 = vector.broadcast %cst_9 : f32 to vector<2x128xf32>
    %22 = arith.select %20, %17, %21 : vector<2x128xi1>, vector<2x128xf32>
    %23 = arith.divf %18, %22 : vector<2x128xf32>
    %24 = arith.mulf %23, %23 : vector<2x128xf32>
    %cst_10 = arith.constant -0.00174370117 : f32
    %25 = vector.broadcast %cst_10 : f32 to vector<2x128xf32>
    %26 = arith.mulf %25, %24 : vector<2x128xf32>
    %cst_11 = arith.constant 0.0106807193 : f32
    %27 = vector.broadcast %cst_11 : f32 to vector<2x128xf32>
    %28 = arith.addf %26, %27 : vector<2x128xf32>
    %29 = arith.mulf %28, %24 : vector<2x128xf32>
    %cst_12 = arith.constant -0.0307175089 : f32
    %30 = vector.broadcast %cst_12 : f32 to vector<2x128xf32>
    %31 = arith.addf %29, %30 : vector<2x128xf32>
    %32 = arith.mulf %31, %24 : vector<2x128xf32>
    %cst_13 = arith.constant 0.0574635565 : f32
    %33 = vector.broadcast %cst_13 : f32 to vector<2x128xf32>
    %34 = arith.addf %32, %33 : vector<2x128xf32>
    %35 = arith.mulf %34, %24 : vector<2x128xf32>
    %cst_14 = arith.constant -0.0837206393 : f32
    %36 = vector.broadcast %cst_14 : f32 to vector<2x128xf32>
    %37 = arith.addf %35, %36 : vector<2x128xf32>
    %38 = arith.mulf %37, %24 : vector<2x128xf32>
    %cst_15 = arith.constant 0.109401986 : f32
    %39 = vector.broadcast %cst_15 : f32 to vector<2x128xf32>
    %40 = arith.addf %38, %39 : vector<2x128xf32>
    %41 = arith.mulf %40, %24 : vector<2x128xf32>
    %cst_16 = arith.constant -0.142615736 : f32
    %42 = vector.broadcast %cst_16 : f32 to vector<2x128xf32>
    %43 = arith.addf %41, %42 : vector<2x128xf32>
    %44 = arith.mulf %43, %24 : vector<2x128xf32>
    %cst_17 = arith.constant 0.1999823 : f32
    %45 = vector.broadcast %cst_17 : f32 to vector<2x128xf32>
    %46 = arith.addf %44, %45 : vector<2x128xf32>
    %47 = arith.mulf %46, %24 : vector<2x128xf32>
    %cst_18 = arith.constant -0.333332837 : f32
    %48 = vector.broadcast %cst_18 : f32 to vector<2x128xf32>
    %49 = arith.addf %47, %48 : vector<2x128xf32>
    %50 = arith.mulf %49, %24 : vector<2x128xf32>
    %cst_19 = arith.constant 1.000000e+00 : f32
    %51 = vector.broadcast %cst_19 : f32 to vector<2x128xf32>
    %52 = arith.addf %50, %51 : vector<2x128xf32>
    %53 = arith.mulf %23, %52 : vector<2x128xf32>
    %54 = arith.cmpf ogt, %16, %15 : vector<2x128xf32>
    %cst_20 = arith.constant 1.57079637 : f32
    %55 = vector.broadcast %cst_20 : f32 to vector<2x128xf32>
    %56 = arith.subf %55, %53 : vector<2x128xf32>
    %57 = arith.select %54, %56, %53 : vector<2x128xi1>, vector<2x128xf32>
    %cst_21 = arith.constant 0.000000e+00 : f32
    %58 = vector.broadcast %cst_21 : f32 to vector<2x128xf32>
    %59 = arith.cmpf olt, %3, %58 : vector<2x128xf32>
    %cst_22 = arith.constant 3.14159274 : f32
    %60 = vector.broadcast %cst_22 : f32 to vector<2x128xf32>
    %61 = arith.subf %60, %57 : vector<2x128xf32>
    %62 = arith.select %59, %61, %57 : vector<2x128xi1>, vector<2x128xf32>
    %cst_23 = arith.constant 0.000000e+00 : f32
    %63 = vector.broadcast %cst_23 : f32 to vector<2x128xf32>
    %64 = arith.cmpf olt, %7, %63 : vector<2x128xf32>
    %cst_24 = arith.constant 0.000000e+00 : f32
    %65 = vector.broadcast %cst_24 : f32 to vector<2x128xf32>
    %66 = arith.subf %65, %62 : vector<2x128xf32>
    %67 = arith.select %64, %66, %62 : vector<2x128xi1>, vector<2x128xf32>
    %cst_25 = arith.constant 0.318309873 : f32
    %68 = vector.broadcast %cst_25 : f32 to vector<2x128xf32>
    %69 = arith.mulf %67, %68 : vector<2x128xf32>
    %c1_26 = arith.constant 1 : index
    %c0_27 = arith.constant 0 : index
    %c0_28 = arith.constant 0 : index
    %70 = vector.load %arg2[%c1_26, %c0_27, %c0_28] : memref<2x2x128xf32, #tpu.memory_space<vmem>>, vector<1x2x128xf32>
    %71 = vector.shape_cast %70 : vector<1x2x128xf32> to vector<2x128xf32>
    %72 = vector.shape_cast %69 : vector<2x128xf32> to vector<1x2x128xf32>
    tpu.vector_store %arg2[%c1_26, %c0_27, %c0_28], %72 {strides = array<i32>} : memref<2x2x128xf32, #tpu.memory_space<vmem>>, vector<1x2x128xf32>,
    return
  }
  func.func @transform_0(%arg0: i32) -> (i32, i32, i32) {
    %c0_i32 = arith.constant 0 : i32
    %c0_i32_0 = arith.constant 0 : i32
    %c0_i32_1 = arith.constant 0 : i32
    return %c0_i32, %arg0, %c0_i32_0 : i32, i32, i32
  }
  func.func @transform_1(%arg0: i32) -> (i32, i32, i32) {
    %c0_i32 = arith.constant 0 : i32
    %c0_i32_0 = arith.constant 0 : i32
    %c0_i32_1 = arith.constant 0 : i32
    return %c0_i32, %arg0, %c0_i32_0 : i32, i32, i32
  }
}

</mosaic_0001>

<bundles_post_ra>
// kernel: tpu_custom_call.1
= control target key start
LH: loop header
LB: loop body
LE: loop exit
PB: predicated region body
PF: predicated region fallthrough
CT: control target
= control target key end

     0   :  { %6 = vsyncpa [#allocation3], 0  ;;  %s201_s0 = inlined_call_operand.hbm [shape: f32[8,2,128], index: 0, kind: input, shape index: {}]   ;;  %s202_s1 = inlined_call_operand.hbm [shape: f32[2,2,128], index: 1, kind: output, shape index: {}]  }
   0x1   :  { %7 = vsyncpa [#allocation4], 0  ;;  %s154_s6 = smov [#allocation2]   ;;  %s106_s10 = scalar_lea.hbm %s201_s0, 64 }
   0x2   :  { %s13_s7 = sshll.u32 %s154_s6, 4  ;;  %p107_p0 = scmp.ne.s32.totalorder %s201_s0, %s106_s10  ;;  %s14_s7 = int_to_ptr.vmem [resolvable:$true] %s13_s7 }
   0x3   :  { %s108_s15 = scalar_lea.hbm %s201_s0, 256  ;;  %p110_p2 = scmp.lt.u32.totalorder %s106_s10, %s201_s0 }
   0x4   :  { %p109_p1 = scmp.lt.u32.totalorder %s108_s15, %s106_s10 }
   0x6   :  { %p111_p3 = por %p110_p2, %p109_p1 }
   0x8   :  { %p112_p4 = pnand %p111_p3, %p107_p0 }
   0xa   :  { %115 = shalt.err (!%p112_p4)
}
   0xb   :  { %s116_s18 = scalar_lea.vmem %s14_s7, 64  ;;  %p121_p6 = scmp.lt.s32.totalorder %s14_s7, %s14_s7 }
   0xc   :  { %p117_p5 = scmp.ne.s32.totalorder %s14_s7, %s116_s18  ;;  %p122_p7 = scmp.lt.s32.totalorder %s116_s18, %s116_s18 }
   0xe   :  { %p123_p8 = por %p122_p7, %p121_p6 }
  0x10   :  { %p124_p9 = pnand %p123_p8, %p117_p5 }
  0x12   :  { %127 = shalt.err (!%p124_p9)
}
  0x13   :  { %s155_s19 = smov 32   ;;  %s156_s20 = smov 2  }
  0x14   :  { %19 = dma.hbm_to_vmem [thread:$0]  %s201_s0, 64, %s14_s7, [#allocation3], %s155_s19, %s155_s19, %s156_s20  }
  0x15   :  { %150 = dma.done.wait [#allocation3], 64  }
  0x16   :  { %151 = vsyncadd [#allocation3], 4294967232  ;;  %v23_v0 = vld [vmem:[#allocation2] sm:$0x3]  ;;  %v26_v1 = vld [vmem:[#allocation2 + $0x2] sm:$0x3] }
  0x17   :  { %v96_v2 = vadd.f32 -0.5, %v23_v0  ;;  %v97_v3 = vadd.f32 -0.5, %v26_v1  ;;  %s157_s0 = smov [#allocation5]  }
  0x18   :  { %s84_s23 = sshll.u32 %s157_s0, 4  ;;  %s85_s23 = int_to_ptr.vmem [resolvable:$true] %s84_s23 }
  0x19   :  { %v28_v4 = vmul.f32 %v96_v2, %v96_v2  ;;  %v29_v5 = vmul.f32 %v97_v3, %v97_v3  ;;  %v39_v6 = vand.u32 2147483647, %v96_v2  ;;  %v40_v7 = vand.u32 2147483647, %v97_v3  ;;  %s128_s24 = scalar_lea.vmem %s85_s23, 64  ;;  %p133_p11 = scmp.lt.s32.totalorder %s85_s23, %s85_s23 }
  0x1a   :  { %vm70_vm4 = vcmp.lt.f32.partialorder %v96_v2, 0.0  ;;  %vm73_vm5 = vcmp.lt.f32.partialorder %v97_v3, 0.0  ;;  %p129_p10 = scmp.ne.s32.totalorder %s85_s23, %s128_s24  ;;  %p134_p12 = scmp.lt.s32.totalorder %s128_s24, %s128_s24 }
  0x1b   :  { %v30_v8 = vadd.f32 %v29_v5, %v28_v4  ;;  %v41_v9 = vmax.f32 %v39_v6, %v40_v7  ;;  %v42_v13 = vmin.f32 %v39_v6, %v40_v7  ;;  %vm67_vm3 = vcmp.gt.f32.partialorder %v40_v7, %v39_v6 }
  0x1c   :  { %p135_p13 = por %p134_p12, %p133_p11 }
  0x1d   :  { %102 = vrsqrt.f32 %v30_v8  ;;  %vm43_vm0 = vcmp.gt.f32.partialorder %v41_v9, 0.0  ;;  %vm33_vm1 = vcmp.eq.f32.partialorder %v30_v8, inf  ;;  %v36_v12 = vand.u32 2147483648, %v30_v8 }
  0x1e   :  { %v44_v10 = vsel %vm43_vm0, %v41_v9, 1.0  ;;  %vm35_vm2 = vcmp.eq.f32.partialorder %v30_v8, 0.0  ;;  %p136_p0 = pnand %p135_p13, %p129_p10 }
  0x1f   :  { %104 = vrcp.f32 %v44_v10 }
  0x27   :  { %v103_v11 = vpop.eup %102 }
  0x28   :  { %v32_v14 = vmul.f32 %v103_v11, %v30_v8 }
  0x29   :  { %v105_v15 = vpop.eup %104 }
  0x2a   :  { %v34_v16 = vsel %vm33_vm1, %v30_v8, %v32_v14  ;;  %v46_v18 = vmul.f32 %v105_v15, %v42_v13 }
  0x2b   :  { %v37_v17 = vsel %vm35_vm2, %v36_v12, %v34_v16 }
  0x2c   :  { %38 = vst [vmem:[#allocation5] sm:$0x3] %v37_v17  ;;  %v47_v19 = vmul.f32 %v46_v18, %v46_v18 }
  0x2e   :  { %v48_v20 = vmul.f32 -0.0017437012, %v47_v19 }
  0x30   :  { %v49_v21 = vadd.f32 0.010680719, %v48_v20 }
  0x32   :  { %v50_v22 = vmul.f32 %v49_v21, %v47_v19 }
  0x34   :  { %v51_v23 = vadd.f32 -0.030717509, %v50_v22 }
  0x36   :  { %v52_v24 = vmul.f32 %v51_v23, %v47_v19 }
  0x38   :  { %v53_v25 = vadd.f32 0.057463557, %v52_v24 }
  0x3a   :  { %v54_v26 = vmul.f32 %v53_v25, %v47_v19 }
  0x3c   :  { %v55_v27 = vadd.f32 -0.08372064, %v54_v26 }
  0x3e   :  { %v56_v28 = vmul.f32 %v55_v27, %v47_v19 }
  0x40   :  { %v57_v29 = vadd.f32 0.109401986, %v56_v28 }
  0x42   :  { %v58_v30 = vmul.f32 %v57_v29, %v47_v19 }
  0x44   :  { %v59_v31 = vadd.f32 -0.14261574, %v58_v30 }
  0x46   :  { %v60_v32 = vmul.f32 %v59_v31, %v47_v19 }
  0x48   :  { %v61_v33 = vadd.f32 0.1999823, %v60_v32 }
  0x4a   :  { %v62_v34 = vmul.f32 %v61_v33, %v47_v19 }
  0x4c   :  { %v63_v35 = vadd.f32 -0.33333284, %v62_v34 }
  0x4e   :  { %v64_v36 = vmul.f32 %v63_v35, %v47_v19 }
  0x50   :  { %v65_v37 = vadd.f32 1.0, %v64_v36 }
  0x52   :  { %v66_v38 = vmul.f32 %v65_v37, %v46_v18 }
  0x54   :  { %v68_v39 = vsub.f32 1.5707964, %v66_v38 }
  0x56   :  { %v69_v40 = vsel %vm67_vm3, %v68_v39, %v66_v38 }
  0x57   :  { %v71_v41 = vsub.f32 3.1415927, %v69_v40 }
  0x59   :  { %v72_v42 = vsel %vm70_vm4, %v71_v41, %v69_v40 }
  0x5a   :  { %v74_v43 = vsub.f32 0.0, %v72_v42 }
  0x5c   :  { %v75_v44 = vsel %vm73_vm5, %v74_v43, %v72_v42 }
  0x5d   :  { %v76_v45 = vmul.f32 0.31830987, %v75_v44 }
  0x5f   :  { %78 = vst [vmem:[#allocation5 + $0x2] sm:$0x3] %v76_v45 }
  0x60   :  { %139 = shalt.err (!%p136_p0)
}
  0x61   :  { %s140_s27 = scalar_lea.hbm %s202_s1, 64 }
  0x62   :  { %p141_p1 = scmp.ne.s32.totalorder %s202_s1, %s140_s27  ;;  %p144_p2 = scmp.lt.u32.totalorder %s140_s27, %s202_s1 }
  0x64   :  { %p146_p3 = pnand %p144_p2, %p141_p1 }
  0x66   :  { %149 = shalt.err (!%p146_p3)
}
  0x67   :  { %90 = dma.vmem_to_hbm [thread:$0]  %s85_s23, 64, %s202_s1, [#allocation4], %s155_s19, %s155_s19, %s156_s20  }
  0x68   :  { %152 = dma.done.wait [#allocation4], 64  }
  0x69   :  { %153 = vsyncadd [#allocation4], 4294967232 }
  0x6a   :  { %94 = vsyncpa [#allocation3], 1 }
  0x6b   :  { %95 = vsyncpa [#allocation4], 1 }

</bundles_post_ra>
